<compile_context>
chip_gen: v5e
topology: v5e:2x2
jax: 0.10.0
libtpu: 0.0.40
codegen_flags: <defaults>
</compile_context>

<pallas_src>
import jax
import jax.numpy as jnp
from jax.experimental import pallas as pl
from jax.experimental.pallas import tpu as pltpu


def _round_up(n, m):
    return ((n + m - 1) // m) * m


def _cdiv(a, b):
    return (a + b - 1) // b


def value_net_kernel(x_ref, w1_ref, b1_ref, w2_ref, o_ref):
    # fc1 on the MXU, state-major: (H, S) @ (S, TB) -> (H, TB), f32 accumulate.
    h = jnp.dot(w1_ref[...], x_ref[...], preferred_element_type=jnp.float32)
    h = jnp.maximum(h + b1_ref[...], 0.0)            # b1 is (H, 1): lane broadcast
    # fc2 on the MXU: (1, H) @ (H, TB) -> (1, TB); already lane-dense, no relayout.
    o_ref[...] = jnp.dot(w2_ref[...], h,
                         preferred_element_type=jnp.float32).astype(o_ref.dtype)


def value_net_forward(x, w1, b1, w2, b2, *, x_state_major=False,
                      stream_dtype=None, max_batch_tile=65536):
    """ValueNet forward: relu(x @ w1.T + b1) @ w2.T + b2  -> (B, 1) f32.

    x : (B, S)  (or (S, B) with x_state_major=True, which skips one transpose)
    w1: (H, S)   b1: (H,)   w2: (1, H)   b2: (1,)    (torch.nn.Linear layouts)
    stream_dtype: e.g. jnp.bfloat16 to halve x/W1 HBM bytes (f32 accumulation
    is kept on the MXU); None keeps the input dtype (exact f32 semantics).
    """
    if x_state_major:
        S, B = x.shape
        x_sm = x
    else:
        B, S = x.shape
        # TODO(synk): callers able to store x state-major (S, B) should pass
        # x_state_major=True and avoid this one-time XLA transpose of x.
        x_sm = x.T
    H = w1.shape[0]
    assert w1.shape == (H, S) and w2.shape == (1, H) and b1.shape == (H,)

    # ---- parameter prep (tiny, stays resident in VMEM across grid steps) ----
    H_pad = _round_up(H, 8)                        # clean sublane tiling for h
    if H_pad != H:
        w1 = jnp.pad(w1, ((0, H_pad - H), (0, 0)))
        b1 = jnp.pad(b1, (0, H_pad - H))
        w2 = jnp.pad(w2, ((0, 0), (0, H_pad - H)))
    b1_col = b1.reshape(H_pad, 1).astype(jnp.float32)
    w2_row = w2.astype(jnp.float32)

    if stream_dtype is not None:
        x_sm = x_sm.astype(stream_dtype)
        w1 = w1.astype(stream_dtype)
    x_itemsize = x_sm.dtype.itemsize
    w_itemsize = w1.dtype.itemsize

    # ---- VMEM-budgeted batch-tile size --------------------------------------
    try:
        vmem_cap = int(getattr(pltpu.get_tpu_info(), "vmem_capacity_bytes",
                               64 << 20))
    except Exception:
        vmem_cap = 64 << 20
    vmem_budget = min(vmem_cap * 3 // 4, 96 << 20)  # ~48 MiB on v7x, <=96 MiB else

    s_sub = _round_up(S, 8)
    # Per-batch-column VMEM bytes: double-buffered x tile + live f32 h tile
    # + double-buffered (sublane-padded) output row.
    per_col = 2 * s_sub * x_itemsize + H_pad * 4 + 2 * 8 * 4
    # Resident, lane-padded params (counted double-buffered to be safe).
    resident = 2 * (H_pad * _round_up(S, 128) * w_itemsize     # w1
                    + _round_up(H_pad, 8) * 128 * 4            # b1 column
                    + 8 * _round_up(H_pad, 128) * 4)           # w2 row

    avail = vmem_budget - resident - (1 << 20)                 # 1 MiB slack
    tb_max = max(128, (avail // per_col) // 128 * 128)
    tb_max = min(tb_max, max(128, _round_up(max_batch_tile, 128)))

    # ---- balanced tiling (no pad-to-full-tile waste) + megacore split -------
    num_tiles = _cdiv(B, tb_max)
    min_split_rows = 1024        # each tile stays a decent DMA after splitting
    if num_tiles == 1 and B >= 2 * min_split_rows:
        num_tiles = 2            # let v7x's second TensorCore participate
    elif num_tiles > 1 and num_tiles % 2 == 1 and \
            _cdiv(B, num_tiles + 1) >= min_split_rows:
        num_tiles += 1           # even split across two TensorCores
    tb = min(tb_max, _round_up(_cdiv(B, num_tiles), 128))
    b_pad = num_tiles * tb
    if b_pad != B:
        x_sm = jnp.pad(x_sm, ((0, 0), (0, b_pad - B)))

    flops = 2 * b_pad * S * H_pad + 3 * b_pad * H_pad
    bytes_accessed = (b_pad * S * x_itemsize + b_pad * 4
                      + H_pad * S * w_itemsize + H_pad * 8)
    footprint = resident + per_col * tb + (1 << 20)
    vmem_limit = int(min(max(footprint, 32 << 20), vmem_cap * 9 // 10))

    out_row = pl.pallas_call(
        value_net_kernel,
        grid_spec=pltpu.PrefetchScalarGridSpec(
            num_scalar_prefetch=0,
            grid=(num_tiles,),
            in_specs=[
                pl.BlockSpec((S, tb), lambda i: (0, i)),       # x streamed, lane-dense
                pl.BlockSpec((H_pad, S), lambda i: (0, 0)),    # w1 resident (torch layout)
                pl.BlockSpec((H_pad, 1), lambda i: (0, 0)),    # b1 column resident
                pl.BlockSpec((1, H_pad), lambda i: (0, 0)),    # w2 row resident
            ],
            out_specs=pl.BlockSpec((1, tb), lambda i: (0, i)), # lane-dense output
        ),
        out_shape=jax.ShapeDtypeStruct((1, b_pad), jnp.float32),
        compiler_params=pltpu.CompilerParams(
            dimension_semantics=("parallel",),
            vmem_limit_bytes=vmem_limit),
        cost_estimate=pl.CostEstimate(
            flops=flops, transcendentals=0, bytes_accessed=bytes_accessed),
    )(x_sm, w1, b1_col, w2_row)

    # (1, b_pad) -> (B, 1); padded columns dropped; b2 added here (tiny fused op).
    return out_row[0, :B].reshape(B, 1) + b2.astype(jnp.float32)


if __name__ == "__main__":
    batch = 4
    state_dim = 8
    hidden_dim = 32

    key = jax.random.PRNGKey(0)
    kx, kw1, kb1, kw2, kb2 = jax.random.split(key, 5)

    x = jax.random.normal(kx, (batch, state_dim), dtype=jnp.float32)
    # Deterministic synthetic parameters (shapes match torch.nn.Linear).
    w1 = jax.random.normal(kw1, (hidden_dim, state_dim), dtype=jnp.float32) * 0.1
    b1 = jax.random.normal(kb1, (hidden_dim,), dtype=jnp.float32) * 0.1
    w2 = jax.random.normal(kw2, (1, hidden_dim), dtype=jnp.float32) * 0.1
    b2 = jax.random.normal(kb2, (1,), dtype=jnp.float32) * 0.1

    out = jax.block_until_ready(value_net_forward(x, w1, b1, w2, b2))

    # Reference check in plain JAX (same math as the PyTorch forward).
    ref = jnp.maximum(x @ w1.T + b1, 0.0) @ w2.T + b2
    assert out.shape == (batch, 1)
    assert jnp.allclose(out, ref, atol=1e-5, rtol=1e-5)

    print("KERNEL_OK")
</pallas_src>

<mosaic_0001>
module attributes {stable_mosaic.version = 11 : i64} {
  func.func @value_net_kernel(%arg0: i32, %arg1: memref<8x128xf32, #tpu.memory_space<vmem>>, %arg2: memref<32x8xf32, #tpu.memory_space<vmem>>, %arg3: memref<32x1xf32, #tpu.memory_space<vmem>>, %arg4: memref<1x32xf32, #tpu.memory_space<vmem>>, %arg5: memref<1x128xf32, #tpu.memory_space<vmem>>) attributes {dimension_semantics = [#tpu.dimension_semantics<parallel>], iteration_bounds = array<i64: 1>, scalar_prefetch = 0 : i64, scratch_operands = 0 : i64, tpu.core_type = #tpu.core_type<tc>, window_params = [{transform_indices = @transform_0, window_bounds = array<i64: 8, 128>}, {pipeline_mode = #tpu.pipeline_mode<synchronous>, transform_indices = @transform_1, window_bounds = array<i64: 32, 8>}, {pipeline_mode = #tpu.pipeline_mode<synchronous>, transform_indices = @transform_2, window_bounds = array<i64: 32, 1>}, {pipeline_mode = #tpu.pipeline_mode<synchronous>, transform_indices = @transform_3, window_bounds = array<i64: 1, 32>}, {transform_indices = @transform_4, window_bounds = array<i64: 1, 128>}]} {
    %c0 = arith.constant 0 : index
    %c0_0 = arith.constant 0 : index
    %0 = vector.load %arg2[%c0, %c0_0] : memref<32x8xf32, #tpu.memory_space<vmem>>, vector<32x8xf32>
    %c0_1 = arith.constant 0 : index
    %c0_2 = arith.constant 0 : index
    %1 = vector.load %arg1[%c0_1, %c0_2] : memref<8x128xf32, #tpu.memory_space<vmem>>, vector<8x128xf32>
    %cst = arith.constant dense<0.000000e+00> : vector<32x128xf32>
    %2 = tpu.matmul %0, %1, %cst {dimension_numbers = #tpu.dot_dimension_numbers<[1], [0], [0], [1], [0, 0, 1, 1], [], []>} : vector<32x8xf32>, vector<8x128xf32>, vector<32x128xf32> -> vector<32x128xf32>
    %c0_3 = arith.constant 0 : index
    %c0_4 = arith.constant 0 : index
    %3 = vector.load %arg3[%c0_3, %c0_4] : memref<32x1xf32, #tpu.memory_space<vmem>>, vector<32x1xf32>
    %4 = vector.broadcast %3 : vector<32x1xf32> to vector<32x128xf32>
    %5 = arith.addf %2, %4 : vector<32x128xf32>
    %cst_5 = arith.constant 0.000000e+00 : f32
    %6 = vector.broadcast %cst_5 : f32 to vector<32x128xf32>
    %7 = arith.maximumf %5, %6 : vector<32x128xf32>
    %c0_6 = arith.constant 0 : index
    %c0_7 = arith.constant 0 : index
    %8 = vector.load %arg4[%c0_6, %c0_7] : memref<1x32xf32, #tpu.memory_space<vmem>>, vector<1x32xf32>
    %cst_8 = arith.constant dense<0.000000e+00> : vector<1x128xf32>
    %9 = tpu.matmul %8, %7, %cst_8 {dimension_numbers = #tpu.dot_dimension_numbers<[1], [0], [0], [1], [0, 0, 1, 1], [], []>} : vector<1x32xf32>, vector<32x128xf32>, vector<1x128xf32> -> vector<1x128xf32>
    %c0_9 = arith.constant 0 : index
    %c0_10 = arith.constant 0 : index
    %10 = vector.load %arg5[%c0_9, %c0_10] : memref<1x128xf32, #tpu.memory_space<vmem>>, vector<1x128xf32>
    tpu.vector_store %arg5[%c0_9, %c0_10], %9 {strides = array<i32>} : memref<1x128xf32, #tpu.memory_space<vmem>>, vector<1x128xf32>,
    return
  }
  func.func @transform_0(%arg0: i32) -> (i32, i32) {
    %c0_i32 = arith.constant 0 : i32
    %c0_i32_0 = arith.constant 0 : i32
    return %c0_i32, %arg0 : i32, i32
  }
  func.func @transform_1(%arg0: i32) -> (i32, i32) {
    %c0_i32 = arith.constant 0 : i32
    %c0_i32_0 = arith.constant 0 : i32
    %c0_i32_1 = arith.constant 0 : i32
    return %c0_i32, %c0_i32_0 : i32, i32
  }
  func.func @transform_2(%arg0: i32) -> (i32, i32) {
    %c0_i32 = arith.constant 0 : i32
    %c0_i32_0 = arith.constant 0 : i32
    %c0_i32_1 = arith.constant 0 : i32
    return %c0_i32, %c0_i32_0 : i32, i32
  }
  func.func @transform_3(%arg0: i32) -> (i32, i32) {
    %c0_i32 = arith.constant 0 : i32
    %c0_i32_0 = arith.constant 0 : i32
    %c0_i32_1 = arith.constant 0 : i32
    return %c0_i32, %c0_i32_0 : i32, i32
  }
  func.func @transform_4(%arg0: i32) -> (i32, i32) {
    %c0_i32 = arith.constant 0 : i32
    %c0_i32_0 = arith.constant 0 : i32
    return %c0_i32, %arg0 : i32, i32
  }
}

</mosaic_0001>

<bundles_post_ra>
// kernel: tpu_custom_call.1
= control target key start
LH: loop header
LB: loop body
LE: loop exit
PB: predicated region body
PF: predicated region fallthrough
CT: control target
= control target key end

     0   :  { %vm47_vm0 = vcmask 64512   ;;  %v172_v5 = vmov 0   ;;  %s236_s0 = inlined_call_operand.vmem [shape: f32[8,128], index: 0, kind: input, shape index: {}]   ;;  %s237_s1 = inlined_call_operand.vmem [shape: f32[32,8], index: 1, kind: input, shape index: {}]   ;;  %s238_s2 = inlined_call_operand.vmem [shape: f32[32,1], index: 2, kind: input, shape index: {}]   ;;  %s239_s3 = inlined_call_operand.vmem [shape: f32[1,32], index: 3, kind: input, shape index: {}]   ;;  %s240_s4 = inlined_call_operand.hbm [shape: f32[1,128], index: 4, kind: output, shape index: {}]  }
   0x1   :  { %v22_v0 = vld [vmem:[%s236_s0] sm:$0xff]  ;;  %v19_v1 = vld [vmem:[%s237_s1 + $0x8] sm:$0xff]  ;;  %v21_v2 = vld [vmem:[%s237_s1 + $0x18] sm:$0xff]  ;;  %144 = vset.pattern.permute.xlu0 %v172_v5 }
   0x2   :  { %140 = vmatpush.msra.mxu2 %v22_v0  ;;  %141 = vmatpush.msra.mxu3 %v22_v0  ;;  %v26_v3 = vld [vmem:[%s238_s2 + $0x18] sm:$0xff]  ;;  %v18_v4 = vld [vmem:[%s237_s1] sm:$0xff]  ;;  %v24_v6 = vld [vmem:[%s238_s2 + $0x8] sm:$0xff] }
   0x3   :  { %136 = vmatmul.msk.f32.vlgmr.msra.gmra.mxu2 %vm47_vm0, %v19_v1  ;;  %138 = vmatmul.msk.f32.vlgmr.msra.gmra.mxu3 %vm47_vm0, %v21_v2 }
   0x4   :  { %75 = vmatpush.msra.mxu0 %v22_v0 }
   0x5   :  { %9 = vsyncpa [#allocation3], 0  ;;  %44 = vperm.xlu0 %144, %v26_v3   ;;  %135 = vmatmul.msk.f32.vlgmr.msra.gmra.mxu0 %vm47_vm0, %v18_v4  ;;  %v20_v7 = vld [vmem:[%s237_s1 + $0x10] sm:$0xff]  ;;  %v23_v9 = vld [vmem:[%s238_s2] sm:$0xff]  ;;  %vm94_vm1 = vcmask 261120   ;;  %s173_s6 = smov [#allocation2]  }
   0x6   :  { %145 = vset.pattern.permute.xlu1 %v172_v5  ;;  %v25_v8 = vld [vmem:[%s238_s2 + $0x10] sm:$0xff]  ;;  %v93_v26 = vld [vmem:[%s239_s3] sm:$0x1]  ;;  %s124_s7 = sshll.u32 %s173_s6, 4  ;;  %s126_s10 = sshll.u32 %s240_s4, 4  ;;  %s125_s7 = int_to_ptr.vmem [resolvable:$true] %s124_s7  ;;  %s127_s10 = int_to_ptr.hbm [resolvable:$true] %s126_s10 }
   0x7   :  { %34 = vperm.xlu1 %145, %v24_v6  }
   0xb   :  { %137 = vmatmul.msk.f32.gmra.mxu2 %vm47_vm0, %v20_v7 }
   0xd   :  { %39 = vperm.xlu0 %144, %v25_v8  }
   0xf   :  { %29 = vperm.xlu1 %145, %v23_v9  }
  0x77   :  { %v45_v10 = vpop.permute.xlu0 %44 }
  0x79   :  { %v35_v11 = vpop.permute.xlu1 %34 }
  0x7f   :  { %v40_v16 = vpop.permute.xlu0 %39 }
  0x81   :  { %v30_v17 = vpop.permute.xlu1 %29 }
  0x82   :  { %v77_v18 = vpop.f32.mrf.mxu0 }
  0x83   :  { %v78_v22 = vadd.f32 %v77_v18, %v30_v17 }
  0x85   :  { %v89_v25 = vmax.f32 %v78_v22, 0.0 }
  0x86   :  { %v80_v12 = vpop.f32.mrf.mxu2  ;;  %v86_v13 = vpop.f32.mrf.mxu3 }
  0x87   :  { %v87_v14 = vadd.f32 %v86_v13, %v45_v10  ;;  %v81_v20 = vadd.f32 %v80_v12, %v35_v11 }
  0x89   :  { %v92_v15 = vmax.f32 %v87_v14, 0.0  ;;  %v90_v24 = vmax.f32 %v81_v20, 0.0 }
  0x8b   :  { %110 = vmatpush.msra.mxu1 %v92_v15 }
  0x8e   :  { %v83_v19 = vpop.f32.mrf.mxu2 }
  0x8f   :  { %v84_v21 = vadd.f32 %v83_v19, %v40_v16 }
  0x91   :  { %v91_v23 = vmax.f32 %v84_v21, 0.0 }
  0x93   :  { %111 = vmatpush.msra.mxu1 %v91_v23 }
  0x95   :  { %112 = vmatpush.msra.mxu1 %v90_v24 }
  0x97   :  { %113 = vmatpush.msra.mxu1 %v89_v25 }
  0x98   :  { %139 = vmatmul.msk.f32.vlgmr.msra.gmra.mxu1 %vm94_vm1, %v93_v26 }
 0x115   :  { %v115_v27 = vpop.f32.mrf.mxu1 }
 0x116   :  { %118 = vst [vmem:[#allocation2] sm:$0x1] %v115_v27 }
 0x117   :  { %129 = dma.vmem_to_hbm [thread:$0]  %s125_s7, 16, %s127_s10, [#allocation3]  }
 0x118   :  { %170 = dma.done.wait [#allocation3], 16  }
 0x119   :  { %171 = vsyncadd [#allocation3], 4294967280 }
 0x11a   :  { %134 = vsyncpa [#allocation3], 1 }

</bundles_post_ra>
